<compile_context>
chip_gen: v6e
topology: v6e:2x2x1
jax: 0.10.0
libtpu: 0.0.40
codegen_flags: <defaults>
</compile_context>

<pallas_src>
import functools

import jax
import jax.numpy as jnp
from jax.experimental import pallas as pl
from jax.experimental.pallas import tpu as pltpu


def _round_up(x, m):
    return (x + m - 1) // m * m


def linear_pair_kernel(x1_ref, x2_ref, w1_ref, w2_ref, b_ref, out_ref):
    """out[tile] = sum(x1*w1, -1) + sum(x2*w2, -1) + b for one batch tile."""
    w1 = w1_ref[...]          # (1, E) — broadcasts over the batch sublanes
    w2 = w2_ref[...]          # (1, E)
    acc = jnp.sum(x1_ref[...] * w1, axis=-1, keepdims=True)       # VPU mul + XLU reduce
    acc = acc + jnp.sum(x2_ref[...] * w2, axis=-1, keepdims=True)
    out_ref[...] = (acc + b_ref[0, 0]).astype(out_ref.dtype)


@functools.partial(jax.jit, static_argnames=("block_b",))
def linear_pair_forward(emb_prot1, emb_prot2, weight, bias, *, block_b=256):
    """emb_prot1/emb_prot2: (B, 1, E); weight: (1, 2E); bias: (1,) -> logits (B, 1)."""
    B = emb_prot1.shape[0]
    E = emb_prot1.shape[-1]
    assert weight.shape == (1, 2 * E), weight.shape   # out_dim == 1 (module default)

    x1 = emb_prot1.reshape(B, E).astype(jnp.float32)
    x2 = emb_prot2.reshape(B, E).astype(jnp.float32)
    # Split the (1, 2E) weight along its input dim: concat-matmul == split-sum.
    w1 = weight[:, :E].astype(jnp.float32)             # (1, E) multiplies protein 1
    w2 = weight[:, E:].astype(jnp.float32)             # (1, E) multiplies protein 2
    b = bias.reshape(1, 1).astype(jnp.float32)         # scalar, kept in SMEM

    # Batch tile: multiple of 8 sublanes, capped at block_b; pad B up to a multiple.
    tb = min(_round_up(block_b, 8), _round_up(B, 8))
    b_pad = _round_up(B, tb)
    if b_pad != B:
        x1 = jnp.pad(x1, ((0, b_pad - B), (0, 0)))
        x2 = jnp.pad(x2, ((0, b_pad - B), (0, 0)))

    grid = (b_pad // tb,)
    out = pl.pallas_call(
        linear_pair_kernel,
        out_shape=jax.ShapeDtypeStruct((b_pad, 1), jnp.float32),
        grid=grid,
        in_specs=[
            pl.BlockSpec((tb, E), lambda i: (i, 0)),            # x1 tile (pipelined)
            pl.BlockSpec((tb, E), lambda i: (i, 0)),            # x2 tile (pipelined)
            pl.BlockSpec((1, E), lambda i: (0, 0)),             # w1 (VMEM resident)
            pl.BlockSpec((1, E), lambda i: (0, 0)),             # w2 (VMEM resident)
            pl.BlockSpec(memory_space=pltpu.MemorySpace.SMEM),  # bias scalar
        ],
        out_specs=pl.BlockSpec((tb, 1), lambda i: (i, 0)),
        compiler_params=pltpu.CompilerParams(
            dimension_semantics=("parallel",)),                 # megacore on v7x
    )(x1, x2, w1, w2, b)
    return out[:B]


def linear_pair_forward_ref(emb_prot1, emb_prot2, weight, bias):
    """Pure-JAX mirror of the PyTorch forward (concat -> view -> Linear)."""
    B = emb_prot1.shape[0]
    concat = jnp.concatenate([emb_prot1, emb_prot2], axis=1).reshape(B, -1)  # (B, 2E)
    return concat @ weight.T + bias                                          # (B, 1)


if __name__ == "__main__":
    B, E = 2, 32

    key = jax.random.PRNGKey(0)
    k1, k2, kw, kb = jax.random.split(key, 4)
    emb_prot1 = jax.random.normal(k1, (B, 1, E), jnp.float32)
    emb_prot2 = jax.random.normal(k2, (B, 1, E), jnp.float32)
    weight = 0.1 * jax.random.normal(kw, (1, 2 * E), jnp.float32)   # nn.Linear.weight
    bias = 0.1 * jax.random.normal(kb, (1,), jnp.float32)           # nn.Linear.bias

    out = linear_pair_forward(emb_prot1, emb_prot2, weight, bias)
    out = jax.block_until_ready(out)

    ref = linear_pair_forward_ref(emb_prot1, emb_prot2, weight, bias)
    assert out.shape == (B, 1), out.shape
    assert jnp.allclose(out, ref, atol=1e-5, rtol=1e-5), (out, ref)

    print("KERNEL_OK")
</pallas_src>

<mosaic_0001>
module attributes {stable_mosaic.version = 11 : i64} {
  func.func @linear_pair_kernel(%arg0: i32, %arg1: memref<8x32xf32, #tpu.memory_space<vmem>>, %arg2: memref<8x32xf32, #tpu.memory_space<vmem>>, %arg3: memref<1x32xf32, #tpu.memory_space<vmem>>, %arg4: memref<1x32xf32, #tpu.memory_space<vmem>>, %arg5: memref<1x1xf32, #tpu.memory_space<smem>>, %arg6: memref<8x1xf32, #tpu.memory_space<vmem>>) attributes {dimension_semantics = [#tpu.dimension_semantics<parallel>], iteration_bounds = array<i64: 1>, scalar_prefetch = 0 : i64, scratch_operands = 0 : i64, tpu.core_type = #tpu.core_type<tc>, window_params = [{transform_indices = @transform_0, window_bounds = array<i64: 8, 32>}, {transform_indices = @transform_1, window_bounds = array<i64: 8, 32>}, {pipeline_mode = #tpu.pipeline_mode<synchronous>, transform_indices = @transform_2, window_bounds = array<i64: 1, 32>}, {pipeline_mode = #tpu.pipeline_mode<synchronous>, transform_indices = @transform_3, window_bounds = array<i64: 1, 32>}, {transform_indices = @transform_4, window_bounds = array<i64: 1, 1>}, {transform_indices = @transform_5, window_bounds = array<i64: 8, 1>}]} {
    %c0 = arith.constant 0 : index
    %c0_0 = arith.constant 0 : index
    %0 = vector.load %arg3[%c0, %c0_0] : memref<1x32xf32, #tpu.memory_space<vmem>>, vector<1x32xf32>
    %c0_1 = arith.constant 0 : index
    %c0_2 = arith.constant 0 : index
    %1 = vector.load %arg4[%c0_1, %c0_2] : memref<1x32xf32, #tpu.memory_space<vmem>>, vector<1x32xf32>
    %c0_3 = arith.constant 0 : index
    %c0_4 = arith.constant 0 : index
    %2 = vector.load %arg1[%c0_3, %c0_4] : memref<8x32xf32, #tpu.memory_space<vmem>>, vector<8x32xf32>
    %3 = vector.broadcast %0 : vector<1x32xf32> to vector<8x32xf32>
    %4 = arith.mulf %2, %3 : vector<8x32xf32>
    %cst = arith.constant dense<0.000000e+00> : vector<8xf32>
    %5 = vector.multi_reduction <add>, %4, %cst [1] : vector<8x32xf32> to vector<8xf32>
    %6 = vector.shape_cast %5 : vector<8xf32> to vector<8x1xf32>
    %c0_5 = arith.constant 0 : index
    %c0_6 = arith.constant 0 : index
    %7 = vector.load %arg2[%c0_5, %c0_6] : memref<8x32xf32, #tpu.memory_space<vmem>>, vector<8x32xf32>
    %8 = vector.broadcast %1 : vector<1x32xf32> to vector<8x32xf32>
    %9 = arith.mulf %7, %8 : vector<8x32xf32>
    %cst_7 = arith.constant dense<0.000000e+00> : vector<8xf32>
    %10 = vector.multi_reduction <add>, %9, %cst_7 [1] : vector<8x32xf32> to vector<8xf32>
    %11 = vector.shape_cast %10 : vector<8xf32> to vector<8x1xf32>
    %12 = arith.addf %6, %11 : vector<8x1xf32>
    %c0_8 = arith.constant 0 : index
    %c0_9 = arith.constant 0 : index
    %13 = memref.load %arg5[%c0_8, %c0_9] : memref<1x1xf32, #tpu.memory_space<smem>>
    %14 = vector.broadcast %13 : f32 to vector<8x1xf32>
    %15 = arith.addf %12, %14 : vector<8x1xf32>
    %c0_10 = arith.constant 0 : index
    %c0_11 = arith.constant 0 : index
    %16 = vector.load %arg6[%c0_10, %c0_11] : memref<8x1xf32, #tpu.memory_space<vmem>>, vector<8x1xf32>
    tpu.vector_store %arg6[%c0_10, %c0_11], %15 {strides = array<i32>} : memref<8x1xf32, #tpu.memory_space<vmem>>, vector<8x1xf32>,
    return
  }
  func.func @transform_0(%arg0: i32) -> (i32, i32) {
    %c0_i32 = arith.constant 0 : i32
    %c0_i32_0 = arith.constant 0 : i32
    return %arg0, %c0_i32 : i32, i32
  }
  func.func @transform_1(%arg0: i32) -> (i32, i32) {
    %c0_i32 = arith.constant 0 : i32
    %c0_i32_0 = arith.constant 0 : i32
    return %arg0, %c0_i32 : i32, i32
  }
  func.func @transform_2(%arg0: i32) -> (i32, i32) {
    %c0_i32 = arith.constant 0 : i32
    %c0_i32_0 = arith.constant 0 : i32
    %c0_i32_1 = arith.constant 0 : i32
    return %c0_i32, %c0_i32_0 : i32, i32
  }
  func.func @transform_3(%arg0: i32) -> (i32, i32) {
    %c0_i32 = arith.constant 0 : i32
    %c0_i32_0 = arith.constant 0 : i32
    %c0_i32_1 = arith.constant 0 : i32
    return %c0_i32, %c0_i32_0 : i32, i32
  }
  func.func @transform_4(%arg0: i32) -> (i32, i32) {
    %c0_i32 = arith.constant 0 : i32
    %c0_i32_0 = arith.constant 0 : i32
    %c0_i32_1 = arith.constant 0 : i32
    return %c0_i32, %c0_i32_0 : i32, i32
  }
  func.func @transform_5(%arg0: i32) -> (i32, i32) {
    %c0_i32 = arith.constant 0 : i32
    %c0_i32_0 = arith.constant 0 : i32
    return %arg0, %c0_i32 : i32, i32
  }
}

</mosaic_0001>

<bundles_post_ra>
// kernel: linear_pair_forward.1
= control target key start
LH: loop header
LB: loop body
LE: loop exit
PB: predicated region body
PF: predicated region fallthrough
CT: control target
= control target key end

     0   :  { %vm31_vm0 = vcmask 261120   ;;  %vm50_vm1 = vcmask 7168   ;;  %s106_s0 = inlined_call_operand.vmem [shape: f32[8,32], index: 0, kind: input, shape index: {}]   ;;  %s107_s2 = inlined_call_operand.vmem [shape: f32[1,32], index: 2, kind: input, shape index: {}]   ;;  %s108_s1 = inlined_call_operand.vmem [shape: f32[8,32], index: 1, kind: input, shape index: {}]   ;;  %s109_s3 = inlined_call_operand.vmem [shape: f32[1,32], index: 3, kind: input, shape index: {}]   ;;  %s110_s4 = inlined_call_operand.<no memory space> [shape: f32[1,1], index: 4, kind: input, shape index: {}]   ;;  %s111_s5 = inlined_call_operand.vmem [shape: f32[8,1], index: 5, kind: output, shape index: {}]  }
   0x1   :  { %v56_v0 = vld [vmem:[%s107_s2] ss:$0 sm:$0xff]  ;;  %v48_v9 = vstv %s110_s4 }
   0x2   :  { %v23_v1 = vld [vmem:[%s106_s0] sm:$0xff] }
   0x3   :  { %v57_v2 = vld [vmem:[%s109_s3] ss:$0 sm:$0xff]  ;;  %v30_v3 = vmul.f32 %v56_v0, %v23_v1 }
   0x4   :  { %v35_v4 = vld [vmem:[%s108_s1] sm:$0xff] }
   0x5   :  { %v42_v5 = vmul.f32 %v57_v2, %v35_v4  ;;  %v32_v6 = vsel %vm31_vm0, %v30_v3, 0.0 }
   0x6   :  { %33 = vadd.xlane.f32.xlu0 %v32_v6 }
   0x7   :  { %v43_v7 = vsel %vm31_vm0, %v42_v5, 0.0 }
   0xa   :  { %44 = vadd.xlane.f32.xlu0 %v43_v7 }
  0x8f   :  { %v34_v8 = vpop.xlane.xlu0 %33 }
  0x93   :  { %v45_v10 = vpop.xlane.xlu0 %44 }
  0x94   :  { %v46_v11 = vadd.f32 %v45_v10, %v34_v8 }
  0x96   :  { %v49_v12 = vadd.f32 %v48_v9, %v46_v11 }
  0x98   :  { %51 = vst.msk [vmem:[%s111_s5] sm:$0xff] %vm50_vm1, %v49_v12 }

</bundles_post_ra>
